<compile_context>
chip_gen: v6e
topology: v6e:2x2x1
jax: 0.10.0
libtpu: 0.0.40
codegen_flags: <defaults>
</compile_context>

<pallas_src>
import jax
import jax.numpy as jnp
from jax import lax
from jax.experimental import pallas as pl
from jax.experimental.pallas import tpu as pltpu


def _fc_softmax_kernel(w_ref, x_ref, o_ref, m_ref, s_ref):
    """Two-phase kernel over grid (phase, n_tile).

    Phase 0: accumulate per-class (row) running max / sum(exp) over all batch
             tiles (online softmax statistics) in VMEM scratch.
    Phase 1: recompute the logits tile and write the normalized softmax.
    """
    p = pl.program_id(0)   # phase: 0 = stats pass, 1 = normalize pass
    i = pl.program_id(1)   # batch-tile index

    @pl.when((p == 0) & (i == 0))
    def _init():
        m_ref[...] = jnp.full(m_ref.shape, -jnp.inf, dtype=m_ref.dtype)
        s_ref[...] = jnp.zeros(s_ref.shape, dtype=s_ref.dtype)

    # Lane-dense logits: contract w (2, D) with x (TILE_N, D) along D -> (2, TILE_N).
    # The MXU consumes the transposed operand directly; no wrapper x.T, no extra
    # HBM pass over the activations.
    logits = lax.dot_general(
        w_ref[...], x_ref[...],
        dimension_numbers=(((1,), (1,)), ((), ())),
        preferred_element_type=jnp.float32,
    )
    # NOTE: nn.Linear's bias is intentionally not applied: Softmax(dim=0) is
    # shift-invariant per class column, so the per-class bias cancels exactly.

    @pl.when(p == 0)
    def _accumulate():
        m_new = jnp.maximum(m_ref[...], jnp.max(logits, axis=-1, keepdims=True))
        s_ref[...] = (s_ref[...] * jnp.exp(m_ref[...] - m_new)
                      + jnp.sum(jnp.exp(logits - m_new), axis=-1, keepdims=True))
        m_ref[...] = m_new

    @pl.when(p == 1)
    def _normalize():
        # Exact divide (not approx reciprocal): keeps the 1e-5 tolerance.
        o_ref[...] = (jnp.exp(logits - m_ref[...]) / s_ref[...]).astype(o_ref.dtype)


def _pick_tile_n(n, d):
    """Lane-dense batch tile, budgeted for double-buffered f32 blocks.

    Prefers 512 (measured ~85% of HBM roofline), stays well under the scoped
    VMEM we request below and under v7x's smaller 64 MiB physical VMEM.
    """
    budget_bytes = 8 * 1024 * 1024          # for one double-buffered x block
    for tile in (512, 256, 128):
        if n % tile == 0 and 2 * tile * d * 4 <= budget_bytes:
            return tile
    return n                                 # small / awkward N: single full tile


def model_forward(x, w, b):
    """Forward of Model with no intermediate layers.

    x: (N, D) f32, w: (2, D) f32, b: (2,) f32 -> (N, 2) f32, softmax over dim 0.
    The bias is not passed to the kernel: it cancels exactly in the dim=0 softmax.
    """
    del b  # cancels in Softmax(dim=0); see kernel note.
    n, d = x.shape
    out_dim = w.shape[0]
    tile_n = _pick_tile_n(n, d)
    nt = n // tile_n

    out_t = pl.pallas_call(
        _fc_softmax_kernel,
        out_shape=jax.ShapeDtypeStruct((out_dim, n), jnp.float32),
        grid=(2, nt),
        in_specs=[
            pl.BlockSpec((out_dim, d), lambda p, i: (0, 0)),   # w: resident
            pl.BlockSpec((tile_n, d), lambda p, i: (i, 0)),    # x tile (both phases)
        ],
        # Phase 0 parks the output on block 0 (never written, never flushed with
        # garbage); phase 1 walks the blocks monotonically and writes each once.
        out_specs=pl.BlockSpec((out_dim, tile_n), lambda p, i: (0, i * p)),
        scratch_shapes=[
            pltpu.VMEM((out_dim, 1), jnp.float32),   # running per-class max
            pltpu.VMEM((out_dim, 1), jnp.float32),   # running per-class sum(exp)
        ],
        compiler_params=pltpu.CompilerParams(
            # Cross-tile softmax stats live in scratch -> both axes sequential.
            dimension_semantics=("arbitrary", "arbitrary"),
            # Above v5e's 16 MiB scoped default; comfortably inside v7x's 64 MiB.
            vmem_limit_bytes=32 * 1024 * 1024,
        ),
    )(w, x)
    # (2, N) lane-dense kernel output -> (N, 2) to match nn.Linear/Softmax output.
    return out_t.T


def reference_forward(x, w, b):
    logits = x @ w.T + b
    return jax.nn.softmax(logits, axis=0)


if __name__ == "__main__":
    # Model(output_dim, input_size, seq_len) with no layers added:
    #   fc = nn.Linear(input_size, 2); fcact = nn.Softmax(dim=0)
    # seq_len / output_dim are unused on the forward path when layers == [].
    key = jax.random.PRNGKey(0)

    def make_case(k, batch, input_size):
        kx, kw, kb = jax.random.split(k, 3)
        x = jax.random.normal(kx, (batch, input_size), dtype=jnp.float32)
        # Mimic nn.Linear's uniform(-1/sqrt(D), 1/sqrt(D)) init, deterministically.
        bound = 1.0 / jnp.sqrt(jnp.float32(input_size))
        w = jax.random.uniform(kw, (2, input_size), minval=-bound, maxval=bound,
                               dtype=jnp.float32)
        b = jax.random.uniform(kb, (2,), minval=-bound, maxval=bound,
                               dtype=jnp.float32)
        return x, w, b

    k1, k2 = jax.random.split(key)

    # Case 1: the module's natural small shape (single-tile path, grid (2, 1)).
    x, w, b = make_case(k1, 8, 32)
    out = jax.block_until_ready(model_forward(x, w, b))
    ref = reference_forward(x, w, b)
    assert out.shape == (8, 2)
    assert jnp.allclose(out, ref, atol=1e-5, rtol=1e-5)

    # Case 2: larger batch exercising the gridded two-phase online-softmax path
    # (TILE_N = 512, two batch tiles, cross-tile stats in VMEM scratch).
    x2, w2, b2 = make_case(k2, 1024, 256)
    out2 = jax.block_until_ready(model_forward(x2, w2, b2))
    ref2 = reference_forward(x2, w2, b2)
    assert out2.shape == (1024, 2)
    assert jnp.allclose(out2, ref2, atol=1e-5, rtol=1e-5)

    print("KERNEL_OK")
</pallas_src>

<mosaic_0001>
module attributes {stable_mosaic.version = 11 : i64} {
  func.func @_fc_softmax_kernel(%arg0: i32, %arg1: i32, %arg2: memref<2x32xf32, #tpu.memory_space<vmem>>, %arg3: memref<8x32xf32, #tpu.memory_space<vmem>>, %arg4: memref<2x8xf32, #tpu.memory_space<vmem>>, %arg5: memref<2x1xf32, #tpu.memory_space<vmem>>, %arg6: memref<2x1xf32, #tpu.memory_space<vmem>>) attributes {dimension_semantics = [#tpu.dimension_semantics<arbitrary>, #tpu.dimension_semantics<arbitrary>], iteration_bounds = array<i64: 2, 1>, scalar_prefetch = 0 : i64, scratch_operands = 2 : i64, tpu.core_type = #tpu.core_type<tc>, window_params = [{pipeline_mode = #tpu.pipeline_mode<synchronous>, transform_indices = @transform_0, window_bounds = array<i64: 2, 32>}, {transform_indices = @transform_1, window_bounds = array<i64: 8, 32>}, {transform_indices = @transform_2, window_bounds = array<i64: 2, 8>}]} {
    %c0_i32 = arith.constant 0 : i32
    %0 = arith.cmpi eq, %arg0, %c0_i32 : i32
    %c0_i32_0 = arith.constant 0 : i32
    %1 = arith.cmpi eq, %arg1, %c0_i32_0 : i32
    %2 = arith.andi %0, %1 : i1
    %3 = arith.extui %2 : i1 to i32
    %c0_i32_1 = arith.constant 0 : i32
    %4 = arith.cmpi ne, %3, %c0_i32_1 : i32
    scf.if %4 {
      %cst_8 = arith.constant 0xFF800000 : f32
      %14 = vector.broadcast %cst_8 : f32 to vector<2x1xf32>
      %c0_9 = arith.constant 0 : index
      %c0_10 = arith.constant 0 : index
      %15 = vector.load %arg5[%c0_9, %c0_10] : memref<2x1xf32, #tpu.memory_space<vmem>>, vector<2x1xf32>
      tpu.vector_store %arg5[%c0_9, %c0_10], %14 {strides = array<i32>} : memref<2x1xf32, #tpu.memory_space<vmem>>, vector<2x1xf32>,
      %cst_11 = arith.constant 0.000000e+00 : f32
      %16 = vector.broadcast %cst_11 : f32 to vector<2x1xf32>
      %c0_12 = arith.constant 0 : index
      %c0_13 = arith.constant 0 : index
      %17 = vector.load %arg6[%c0_12, %c0_13] : memref<2x1xf32, #tpu.memory_space<vmem>>, vector<2x1xf32>
      tpu.vector_store %arg6[%c0_12, %c0_13], %16 {strides = array<i32>} : memref<2x1xf32, #tpu.memory_space<vmem>>, vector<2x1xf32>,
    } else {
    }
    %c0 = arith.constant 0 : index
    %c0_2 = arith.constant 0 : index
    %5 = vector.load %arg2[%c0, %c0_2] : memref<2x32xf32, #tpu.memory_space<vmem>>, vector<2x32xf32>
    %c0_3 = arith.constant 0 : index
    %c0_4 = arith.constant 0 : index
    %6 = vector.load %arg3[%c0_3, %c0_4] : memref<8x32xf32, #tpu.memory_space<vmem>>, vector<8x32xf32>
    %cst = arith.constant dense<0.000000e+00> : vector<2x8xf32>
    %7 = tpu.matmul %5, %6, %cst {dimension_numbers = #tpu.dot_dimension_numbers<[1], [1], [0], [0], [0, 0, 1, 0], [], []>} : vector<2x32xf32>, vector<8x32xf32>, vector<2x8xf32> -> vector<2x8xf32>
    %c0_i32_5 = arith.constant 0 : i32
    %8 = arith.cmpi eq, %arg0, %c0_i32_5 : i32
    %9 = arith.extui %8 : i1 to i32
    %c0_i32_6 = arith.constant 0 : i32
    %10 = arith.cmpi ne, %9, %c0_i32_6 : i32
    scf.if %10 {
      %c0_8 = arith.constant 0 : index
      %c0_9 = arith.constant 0 : index
      %14 = vector.load %arg5[%c0_8, %c0_9] : memref<2x1xf32, #tpu.memory_space<vmem>>, vector<2x1xf32>
      %cst_10 = arith.constant dense<0xFF800000> : vector<2xf32>
      %15 = vector.multi_reduction <maximumf>, %7, %cst_10 [1] : vector<2x8xf32> to vector<2xf32>
      %16 = vector.shape_cast %15 : vector<2xf32> to vector<2x1xf32>
      %17 = arith.maximumf %14, %16 : vector<2x1xf32>
      %c0_11 = arith.constant 0 : index
      %c0_12 = arith.constant 0 : index
      %18 = vector.load %arg6[%c0_11, %c0_12] : memref<2x1xf32, #tpu.memory_space<vmem>>, vector<2x1xf32>
      %c0_13 = arith.constant 0 : index
      %c0_14 = arith.constant 0 : index
      %19 = vector.load %arg5[%c0_13, %c0_14] : memref<2x1xf32, #tpu.memory_space<vmem>>, vector<2x1xf32>
      %20 = arith.subf %19, %17 : vector<2x1xf32>
      %21 = math.exp %20 : vector<2x1xf32>
      %22 = arith.mulf %18, %21 : vector<2x1xf32>
      %23 = vector.broadcast %17 : vector<2x1xf32> to vector<2x8xf32>
      %24 = arith.subf %7, %23 : vector<2x8xf32>
      %25 = math.exp %24 : vector<2x8xf32>
      %cst_15 = arith.constant dense<0.000000e+00> : vector<2xf32>
      %26 = vector.multi_reduction <add>, %25, %cst_15 [1] : vector<2x8xf32> to vector<2xf32>
      %27 = vector.shape_cast %26 : vector<2xf32> to vector<2x1xf32>
      %28 = arith.addf %22, %27 : vector<2x1xf32>
      %c0_16 = arith.constant 0 : index
      %c0_17 = arith.constant 0 : index
      %29 = vector.load %arg6[%c0_16, %c0_17] : memref<2x1xf32, #tpu.memory_space<vmem>>, vector<2x1xf32>
      tpu.vector_store %arg6[%c0_16, %c0_17], %28 {strides = array<i32>} : memref<2x1xf32, #tpu.memory_space<vmem>>, vector<2x1xf32>,
      %c0_18 = arith.constant 0 : index
      %c0_19 = arith.constant 0 : index
      %30 = vector.load %arg5[%c0_18, %c0_19] : memref<2x1xf32, #tpu.memory_space<vmem>>, vector<2x1xf32>
      tpu.vector_store %arg5[%c0_18, %c0_19], %17 {strides = array<i32>} : memref<2x1xf32, #tpu.memory_space<vmem>>, vector<2x1xf32>,
    } else {
    }
    %c1_i32 = arith.constant 1 : i32
    %11 = arith.cmpi eq, %arg0, %c1_i32 : i32
    %12 = arith.extui %11 : i1 to i32
    %c0_i32_7 = arith.constant 0 : i32
    %13 = arith.cmpi ne, %12, %c0_i32_7 : i32
    scf.if %13 {
      %c0_8 = arith.constant 0 : index
      %c0_9 = arith.constant 0 : index
      %14 = vector.load %arg5[%c0_8, %c0_9] : memref<2x1xf32, #tpu.memory_space<vmem>>, vector<2x1xf32>
      %15 = vector.broadcast %14 : vector<2x1xf32> to vector<2x8xf32>
      %16 = arith.subf %7, %15 : vector<2x8xf32>
      %17 = math.exp %16 : vector<2x8xf32>
      %c0_10 = arith.constant 0 : index
      %c0_11 = arith.constant 0 : index
      %18 = vector.load %arg6[%c0_10, %c0_11] : memref<2x1xf32, #tpu.memory_space<vmem>>, vector<2x1xf32>
      %19 = vector.broadcast %18 : vector<2x1xf32> to vector<2x8xf32>
      %20 = arith.divf %17, %19 : vector<2x8xf32>
      %c0_12 = arith.constant 0 : index
      %c0_13 = arith.constant 0 : index
      %21 = vector.load %arg4[%c0_12, %c0_13] : memref<2x8xf32, #tpu.memory_space<vmem>>, vector<2x8xf32>
      tpu.vector_store %arg4[%c0_12, %c0_13], %20 {strides = array<i32>} : memref<2x8xf32, #tpu.memory_space<vmem>>, vector<2x8xf32>,
    } else {
    }
    return
  }
  func.func @transform_0(%arg0: i32, %arg1: i32) -> (i32, i32) {
    %c0_i32 = arith.constant 0 : i32
    %c0_i32_0 = arith.constant 0 : i32
    %c0_i32_1 = arith.constant 0 : i32
    return %c0_i32, %c0_i32_0 : i32, i32
  }
  func.func @transform_1(%arg0: i32, %arg1: i32) -> (i32, i32) {
    %c0_i32 = arith.constant 0 : i32
    %c0_i32_0 = arith.constant 0 : i32
    return %arg1, %c0_i32 : i32, i32
  }
  func.func @transform_2(%arg0: i32, %arg1: i32) -> (i32, i32) {
    %0 = arith.muli %arg1, %arg0 : i32
    %c0_i32 = arith.constant 0 : i32
    %c0_i32_0 = arith.constant 0 : i32
    return %c0_i32, %0 : i32, i32
  }
}

</mosaic_0001>

<bundles_post_ra>
// kernel: tpu_custom_call.1
= control target key start
LH: loop header
LB: loop body
LE: loop exit
PB: predicated region body
PF: predicated region fallthrough
CT: control target
= control target key end

     0   :  { %7 = vsyncpa [#allocation5], 0  ;;  %s738_s0 = inlined_call_operand.hbm [shape: f32[2,32], index: 0, kind: input, shape index: {}]   ;;  %s739_s1 = inlined_call_operand.hbm [shape: f32[8,32], index: 1, kind: input, shape index: {}]   ;;  %s740_s2 = inlined_call_operand.hbm [shape: f32[2,8], index: 2, kind: output, shape index: {}]  }
   0x1   :  { %8 = vsyncpa [#allocation8], 0 }
   0x2   :  { %9 = vsyncpa [#allocation6], 0 }
   0x3   :  { %11 = vsyncpa [#allocation6 + $0x1], 0  ;;  %s638_s9 = smov 0   ;;  %s640_s10 = smov 0  }
   0x4   :  { %s642_s11 = smov 0  }
   0x5 LB: > { %s404_s12 = sadd.s32 4294967295, %s612_s11   ;;  %s405_s13 = sadd.s32 4294967294, %s612_s11   ;;  %s612_s11 = sphi %s642_s11, %s17_s11   ;;  %s608_s10 = sphi %s640_s10, %s751_s10   ;;  %s604_s9 = sphi %s638_s9, %s750_s9  }
   0x6   : > { %s29_s14 = sadd.s32 1, %s608_s10  ;;  %p406_p0 = scmp.ge.s32.totalorder %s612_s11, 1 }
   0x7   : > { %p31_p1 = scmp.ge.s32.totalorder %s29_s14, 2  ;;  %p109_p2 = scmp.lt.s32.totalorder %s612_s11, 3 }
   0x8   : > { %p660_p3 = scmp.eq.s32.totalorder %s404_s12, 0  ;;  %s614_s17 = smov [#allocation4]  }
   0x9   : > { %s753_s14 = smov (%p31_p1, %s29_s14), 0  ;;  %p666_p4 = pnand %p406_p0, %p109_p2 }
   0xa   : > { %s744_s15 = scalar_select %p660_p3, 1, 0 }
   0xb   : > { %s745_s16 = scalar_select %p666_p4, 1, 0 }
   0xc   : > { %s122_s18 = sshll.u32 %s614_s17, 4  ;;  %p441_p5 = pneg %p666_p4  ;;  %s123_s18 = int_to_ptr.vmem [resolvable:$true] %s122_s18 }
   0xd   : > { %s615_s19 = smov [#allocation7]   ;;  %s513_s22 = scalar_lea.vmem %s123_s18, 32 }
   0xe   : > { %s135_s20 = sshll.u32 %s615_s19, 4  ;;  %p674_p6 = pnand %p660_p3, %p441_p5  ;;  %s136_s20 = int_to_ptr.vmem [resolvable:$true] %s135_s20 }
   0xf   : > { %p514_p8 = scmp.ne.s32.totalorder %s123_s18, %s513_s22  ;;  %p521_p11 = scmp.lt.s32.totalorder %s123_s18, %s123_s18 }
  0x10   : > { %p504_p7 = pneg %p674_p6  ;;  %p522_p12 = scmp.lt.s32.totalorder %s513_s22, %s513_s22 }
  0x12   : > { %p516_p9 = pnand %p514_p8, %p504_p7  ;;  %p523_p13 = por %p522_p12, %p521_p11 }
  0x14   : > { %p517_p10 = pneg %p516_p9 }
  0x16   : > { %p524_p0 = pnand %p523_p13, %p517_p10 }
  0x18   : > { %527 = shalt.err (!%p524_p0)
}
  0x19   : > { %444 = dma.hbm_to_vmem [thread:$0]  (!%p674_p6), %s738_s0, 32, %s123_s18, [#allocation5]  }
  0x1a   : > { %s539_s25 = scalar_lea.vmem %s136_s20, 128  ;;  %p547_p8 = scmp.lt.s32.totalorder %s136_s20, %s136_s20 }
  0x1b   : > { %p540_p1 = scmp.ne.s32.totalorder %s136_s20, %s539_s25  ;;  %p548_p9 = scmp.lt.s32.totalorder %s539_s25, %s539_s25 }
  0x1d   : > { %p542_p2 = pnand %p540_p1, %p504_p7  ;;  %p549_p3 = por %p548_p9, %p547_p8 }
  0x1f   : > { %p543_p5 = pneg %p542_p2 }
  0x21   : > { %p550_p4 = pnand %p549_p3, %p543_p5 }
  0x23   : > { %553 = shalt.err (!%p550_p4)
}
  0x24   : > { %447 = dma.hbm_to_vmem [thread:$0]  (!%p674_p6), %s739_s1, 128, %s136_s20, [#allocation8]  }
  0x25   : > { %p747_p10 = scmp.ne.s32.totalorder %s745_s16, 0 }
  0x26   : > { %p748_p11 = scmp.ne.s32.totalorder (!%p747_p10), %s744_s15, 0 }
  0x27   : > { %148 = sbr.rel (%p747_p10) target bundleno = 848 (0x350), region = 28 }
  0x2c   : > { %591 = dma.done.wait (%p748_p11), [#allocation5], 32  }
  0x2d   : > { %593 = vsyncadd (%p748_p11), [#allocation5], 4294967264 }
  0x2e   : > { %595 = dma.done.wait (%p748_p11), [#allocation8], 128  }
  0x2f   : > { %597 = vsyncadd (%p748_p11), [#allocation8], 4294967168  ;;  %p170_p3 = scmp.eq.s32.totalorder %s604_s9, 0 }
  0x30   : > { %vm176_vm0 = vcmask (%p170_p3), 1024   ;;  %v616_v0 = vmov (%p170_p3), -inf   ;;  %v617_v1 = vmov (%p170_p3), 0.0  }
  0x31   : > { %175 = sbr.rel (!%p170_p3) target bundleno = 54 (0x36), region = 40  ;;  %177 = vst.msk [vmem:[#allocation2] sm:$0x3] (%p170_p3), %vm176_vm0, %v616_v0  ;;  %178 = vst.msk [vmem:[#allocation3] sm:$0x3] (%p170_p3), %vm176_vm0, %v617_v1 }
  0x36 PF: > { %v180_v2 = vld [vmem:[#allocation7] sm:$0xff]  ;;  %vm181_vm1 = vcmask 261120   ;;  %v618_v3 = vmov 0.0   ;;  %vm619_vm2 = vmmov 0   ;;  %v179_v4 = vld [vmem:[#allocation4] sm:$0x3] }
  0x37   : > { %424 = vmatprep.subr.mxu0 %v618_v3  ;;  %426 = vmatprep.mubr.msk.f32.mxu0 %vm619_vm2, %v618_v3  ;;  %p415_p4 = scmp.ne.s32.totalorder %s604_s9, 0 }
  0x38   : > { %425 = vmatpush3.xpose.msk.msra.mxu0 %vm181_vm1, %v180_v2 }
  0x3b   : > { %427 = vmatmul.mubr.msk.f32.vlgmr.msra.gmra.mxu0 %vm181_vm1, %v179_v4 }
  0xf9   : > { %260 = sbr.rel (%p415_p4) target bundleno = 680 (0x2a8), region = 44 }
  0xfb   : > { %v254_v5 = vpop.f32.mrf.mxu0 }
  0xfd   : > { %v428_v6 = vpop.f32.mrf.mxu0 }
  0xfe   : > { %vm262_vm3 = vcmask 58368   ;;  %v620_v8 = vmov 0   ;;  %v261_v9 = vld [vmem:[#allocation2] sm:$0x3]  ;;  %vm284_vm4 = vcmask 1024  }
  0xff   : > { %v263_v7 = vsel %vm262_vm3, %v254_v5, -inf  ;;  %492 = vset.pattern.permute.xlu0 %v620_v8  ;;  %v267_v20 = vld [vmem:[#allocation3] sm:$0x3] }
 0x100   : > { %264 = vmax.xlane.f32.xlu0 %v263_v7 }
 0x189   : > { %v265_v10 = vpop.xlane.xlu0 %264 }
 0x18a   : > { %v266_v11 = vmax.f32 %v261_v9, %v265_v10 }
 0x18c   : > { %v268_v12 = vsub.f32 %v261_v9, %v266_v11  ;;  %286 = vst.msk [vmem:[#allocation2] sm:$0x3] %vm284_vm4, %v266_v11  ;;  %274 = vperm.xlu0 %492, %v266_v11  }
 0x18e   : > { %v269_v18 = vmul.f32 1.442695, %v268_v12 }
 0x207   : > { %v275_v13 = vpop.permute.xlu0 %274 }
 0x208   : > { %v277_v14 = vsub.f32 %v254_v5, %v275_v13 }
 0x20a   : > { %v278_v15 = vmul.f32 1.442695, %v277_v14 }
 0x20c   : > { %493 = vpow2.f32 %v278_v15 }
 0x20d   : > { %495 = vpow2.f32 %v269_v18 }
 0x219   : > { %v494_v16 = vpop.eup %493 }
 0x21a   : > { %v280_v17 = vsel %vm262_vm3, %v494_v16, 0.0  ;;  %v496_v19 = vpop.eup %495 }
 0x21b   : > { %281 = vadd.xlane.f32.xlu1 %v280_v17  ;;  %v271_v21 = vmul.f32 %v496_v19, %v267_v20 }
 0x2a4   : > { %v282_v22 = vpop.xlane.xlu1 %281 }
 0x2a5   : > { %v283_v23 = vadd.f32 %v282_v22, %v271_v21 }
 0x2a7   : > { %285 = vst.msk [vmem:[#allocation3] sm:$0x3] %vm284_vm4, %v283_v23 }
 0x2a8 PF: > { %p416_p6 = scmp.ne.s32.totalorder %s604_s9, 1 }
 0x2aa   : > { %290 = sbr.rel (%p416_p6) target bundleno = 835 (0x343), region = 48 }
 0x2af   : > { %v291_v24 = vld [vmem:[#allocation2] sm:$0x3]  ;;  %v621_v25 = vmov 0   ;;  %v300_v26 = vld [vmem:[#allocation3] sm:$0x3]  ;;  %vm308_vm5 = vcmask 58368  }
 0x2b0   : > { %497 = vset.pattern.permute.xlu0 %v621_v25 }
 0x2b1   : > { %294 = vperm.xlu0 %497, %v291_v24  }
 0x2b5   : > { %303 = vperm.xlu0 %497, %v300_v26  }
 0x32c   : > { %v295_v27 = vpop.permute.xlu0 %294 }
 0x32d   : > { %v297_v28 = vsub.f32 %v254_v5, %v295_v27 }
 0x32f   : > { %v298_v29 = vmul.f32 1.442695, %v297_v28 }
 0x330   : > { %v304_v30 = vpop.permute.xlu0 %303 }
 0x331   : > { %498 = vpow2.f32 %v298_v29 }
 0x332   : > { %500 = vrcp.f32 %v304_v30 }
 0x33e   : > { %v499_v31 = vpop.eup %498 }
 0x33f   : > { %v501_v32 = vpop.eup %500 }
 0x340   : > { %v307_v33 = vmul.f32 %v501_v32, %v499_v31 }
 0x342   : > { %309 = vst.msk [vmem:[#allocation9] sm:$0x3] %vm308_vm5, %v307_v33 }
 0x343 PF: > { %p715_p7 = scmp.eq.s32.totalorder %s404_s12, 1  ;;  %s622_s29 = smov [#allocation9]  }
 0x344   : > { %s325_s30 = sshll.u32 %s622_s29, 4  ;;  %s326_s30 = int_to_ptr.vmem [resolvable:$true] %s325_s30 }
 0x345   : > { %s554_s3 = scalar_lea.vmem %s326_s30, 32  ;;  %s560_s4 = scalar_lea.vmem %s326_s30, 64 }
 0x346   : > { %p555_p12 = scmp.ne.s32.totalorder %s326_s30, %s554_s3  ;;  %p561_p1 = scmp.lt.s32.totalorder %s326_s30, %s326_s30 }
 0x347   : > { %p562_p2 = scmp.lt.s32.totalorder %s560_s4, %s554_s3 }
 0x348   : > { %p556_p13 = pnand %p555_p12, %p715_p7 }
 0x349   : > { %p563_p5 = por %p562_p2, %p561_p1 }
 0x34a   : > { %p557_p0 = pneg %p556_p13 }
 0x34c   : > { %p564_p8 = pnand %p563_p5, %p557_p0 }
 0x34e   : > { %567 = shalt.err (!%p564_p8)
}
 0x34f   : > { %438 = dma.vmem_to_hbm [thread:$0]  (%p715_p7), %s326_s30, 32, %s740_s2, [#allocation6]  }
 0x350 PF: > { %p457_p9 = scmp.ge.s32.totalorder %s612_s11, 2  ;;  %p458_p10 = scmp.eq.s32.totalorder %s405_s13, 1 }
 0x352   : > { %p449_p11 = pnand %p458_p10, %p457_p9 }
 0x354   : > { %p450_p3 = pneg %p449_p11 }
 0x356   : > { %599 = dma.done.wait (%p450_p3), [#allocation6], 32  }
 0x357   : > { %601 = vsyncadd (%p450_p3), [#allocation6], 4294967264  ;;  %s17_s11 = sadd.s32 1, %s612_s11   ;;  %s750_s9 = smov %s608_s10 }
 0x358   : > { %p14_p4 = scmp.ge.s32.totalorder %s17_s11, 4   ;;  %s751_s10 = smov %s753_s14 }
 0x35a   :  { %16 = sbr.rel (!%p14_p4) target bundleno = 5 (0x5), region = 82 }
 0x35f   :  { %343 = vsyncpa [#allocation5], 1 }
 0x360   :  { %345 = vsyncpa [#allocation5 + $0x1], 1 }
 0x361   :  { %346 = vsyncpa [#allocation8], 1 }
 0x362   :  { %347 = vsyncpa [#allocation6], 1 }
 0x363   :  { %349 = vsyncpa [#allocation6 + $0x1], 1 }

</bundles_post_ra>
